<compile_context>
chip_gen: v7x
topology: tpu7x:2x2x1
jax: 0.10.0
libtpu: 0.0.40
codegen_flags: <defaults>
</compile_context>

<pallas_src>
import functools

import jax
import jax.numpy as jnp
from jax.experimental import pallas as pl
from jax.experimental.pallas import tpu as pltpu


def _round_up(x, m):
    return (x + m - 1) // m * m


def _mlp_kernel(params_ref, x_ref, o_ref, *, layer_meta, skip_connections,
                out_activation, in_dim, mxu_dtype):
    """Whole MLP for one (features, tm) column tile.

    params_ref: packed (P_rows, P_cols) parameter slab, resident in VMEM.
    x_ref:      (in_dim, tm)  -- batch rows on lanes, features on sublanes.
    o_ref:      (out_dim, tm) -- lane-dense output tile.
    """
    num_layers = len(layer_meta)
    x_in = x_ref[...].astype(jnp.float32)            # (in_dim, tm)
    x = x_in
    for i, (row_off, fan_out, fan_in) in enumerate(layer_meta):
        # Static slices out of the packed, VMEM-resident parameter slab.
        w = params_ref[row_off:row_off + fan_out, 0:fan_in]            # (out, in)
        b = params_ref[row_off:row_off + fan_out, fan_in:fan_in + 1]   # (out, 1)
        if i in skip_connections:
            # torch.cat([x_in, x], -1) followed by Linear == two MXU pushes
            # against a statically split weight (first in_dim columns act on
            # the original input, the rest on the current activations).
            w_in = w[:, :in_dim].astype(mxu_dtype)
            w_h = w[:, in_dim:].astype(mxu_dtype)
            y = jnp.dot(w_in, x_in.astype(mxu_dtype),
                        preferred_element_type=jnp.float32)
            y = y + jnp.dot(w_h, x.astype(mxu_dtype),
                            preferred_element_type=jnp.float32)
        else:
            y = jnp.dot(w.astype(mxu_dtype), x.astype(mxu_dtype),
                        preferred_element_type=jnp.float32)
        y = y + b                                    # bias add in f32 (VPU)
        if i < num_layers - 1:
            y = jnp.maximum(y, 0.0)                  # nn.ReLU, in f32
        x = y
    if out_activation is not None:
        x = out_activation(x)
    o_ref[...] = x.astype(o_ref.dtype)


def pack_params(weights, biases):
    """Pack all (out,in) weights and biases into one f32 slab + static metadata.

    Layer i occupies rows [off_i, off_i + fan_out_i)  (each layer's row block
    padded to a multiple of 8 sublanes); columns [0, fan_in_i) hold W and
    column fan_in_i holds b.  Returns (packed, layer_meta) where
    layer_meta[i] = (row_off, fan_out, fan_in).
    """
    fan_outs = [int(w.shape[0]) for w in weights]
    fan_ins = [int(w.shape[1]) for w in weights]
    n_cols = _round_up(max(fan_ins) + 1, 128)        # lane-aligned slab width
    offs, off = [], 0
    for fo in fan_outs:
        offs.append(off)
        off += _round_up(fo, 8)
    n_rows = _round_up(off, 8)

    packed = jnp.zeros((n_rows, n_cols), jnp.float32)
    meta = []
    for w, b, fo, fi, ro in zip(weights, biases, fan_outs, fan_ins, offs):
        packed = packed.at[ro:ro + fo, 0:fi].set(w.astype(jnp.float32))
        packed = packed.at[ro:ro + fo, fi].set(
            jnp.reshape(b.astype(jnp.float32), (fo,)))
        meta.append((ro, fo, fi))
    return packed, tuple(meta)


def mlp_forward_pallas(x2d, weights, biases, skip_connections=(),
                       out_activation=None, tm=512, mxu_dtype=jnp.float32):
    """x2d: (N, in_dim). weights[i]: (fan_out_i, fan_in_i) (PyTorch layout).
    biases[i]: (fan_out_i,).  Returns (N, out_dim)."""
    N, in_dim = x2d.shape
    out_dim = int(weights[-1].shape[0])

    packed, layer_meta = pack_params(weights, biases)

    # Clamp / align the row tile: multiple of 128 lanes, no larger than needed.
    tm = _round_up(min(tm, _round_up(N, 128)), 128)
    grid = (pl.cdiv(N, tm),)

    kernel = functools.partial(
        _mlp_kernel,
        layer_meta=layer_meta,
        skip_connections=frozenset(skip_connections),
        out_activation=out_activation,
        in_dim=in_dim,
        mxu_dtype=mxu_dtype,
    )

    flops = 2 * N * sum(int(w.shape[0]) * int(w.shape[1]) for w in weights)
    bytes_accessed = (x2d.size * x2d.dtype.itemsize
                      + packed.size * packed.dtype.itemsize
                      + N * out_dim * x2d.dtype.itemsize)

    x_t = x2d.T                                      # (in_dim, N): rows -> lanes

    # NOTE: the packed-param BlockSpec has a constant index_map so it is
    # fetched once and stays resident; on v7x it could additionally be
    # single-buffered (pipeline_mode=pl.Buffered(1)) to halve its footprint,
    # but at these sizes (<64 KiB) it is irrelevant.
    out_t = pl.pallas_call(
        kernel,
        out_shape=jax.ShapeDtypeStruct((out_dim, N), x2d.dtype),
        grid_spec=pltpu.PrefetchScalarGridSpec(
            num_scalar_prefetch=0,
            grid=grid,
            in_specs=[
                pl.BlockSpec(packed.shape, lambda i: (0, 0)),   # one DMA, resident
                pl.BlockSpec((in_dim, tm), lambda i: (0, i)),   # x^T column tile
            ],
            out_specs=pl.BlockSpec((out_dim, tm), lambda i: (0, i)),
        ),
        compiler_params=pltpu.CompilerParams(dimension_semantics=("parallel",)),
        cost_estimate=pl.CostEstimate(flops=flops, transcendentals=0,
                                      bytes_accessed=bytes_accessed),
    )(packed, x_t)

    return out_t.T                                   # back to (N, out_dim)


def init_mlp_params(key, in_dim, num_layers, layer_width, out_dim,
                    skip_connections=(), zero_init=False):
    """Deterministic params matching the PyTorch module's layer shapes.

    Weights are stored in PyTorch (fan_out, fan_in) layout, biases as (fan_out,).
    Uses nn.Linear's default U(-1/sqrt(fan_in), 1/sqrt(fan_in)) init.
    """
    skips = set(skip_connections) if skip_connections else set()
    dims = []
    if num_layers == 1:
        dims.append((out_dim, in_dim))
    else:
        for i in range(num_layers - 1):
            if i == 0:
                dims.append((layer_width, in_dim))
            elif i in skips:
                dims.append((layer_width, layer_width + in_dim))
            else:
                dims.append((layer_width, layer_width))
        dims.append((out_dim, layer_width))

    weights, biases = [], []
    for li, (fan_out, fan_in) in enumerate(dims):
        key, kw, kb = jax.random.split(key, 3)
        bound = 1.0 / float(fan_in) ** 0.5
        w = jax.random.uniform(kw, (fan_out, fan_in), jnp.float32, -bound, bound)
        b = jax.random.uniform(kb, (fan_out,), jnp.float32, -bound, bound)
        if zero_init and li == len(dims) - 1:
            w = jnp.zeros_like(w)
            b = jnp.zeros_like(b)
        weights.append(w)
        biases.append(b)
    return weights, biases


def mlp_reference(x2d, weights, biases, skip_connections=(), out_activation=None):
    """Pure-JAX reference mirroring MLP.pytorch_fwd (row-major, x @ W.T + b)."""
    skips = set(skip_connections)
    x_in = x2d
    x = x_in
    n = len(weights)
    for i, (w, b) in enumerate(zip(weights, biases)):
        if i in skips:
            x = jnp.concatenate([x_in, x], axis=-1)
        x = x @ w.T + b
        if i < n - 1:
            x = jnp.maximum(x, 0.0)
    if out_activation is not None:
        x = out_activation(x)
    return x


if __name__ == "__main__":
    # Module config (small): MLP(in_dim=16, num_layers=4, layer_width=32,
    #                            out_dim=8, skip_connections=(2,), activation=ReLU)
    in_dim = 16
    num_layers = 4
    layer_width = 32
    out_dim = 8
    skip_connections = (2,)
    out_activation = None  # module default

    key = jax.random.PRNGKey(0)
    key, kx = jax.random.split(key)

    # in_tensor: [*bs, in_dim] with *bs = (2, 128)
    in_tensor = jax.random.normal(kx, (2, 128, in_dim), jnp.float32)

    weights, biases = init_mlp_params(
        key, in_dim, num_layers, layer_width, out_dim,
        skip_connections=skip_connections, zero_init=False)

    # Flatten leading batch dims -> rows; kernel transposes to put rows on lanes.
    x2d = in_tensor.reshape(-1, in_dim)

    ref2d = mlp_reference(x2d, weights, biases,
                          skip_connections=skip_connections,
                          out_activation=out_activation)

    # (1) f32 MXU path, single grid step (tm auto-clamped): exact semantics.
    out_f32 = mlp_forward_pallas(
        x2d, weights, biases,
        skip_connections=skip_connections,
        out_activation=out_activation,
        tm=512, mxu_dtype=jnp.float32)
    out_f32 = jax.block_until_ready(out_f32)
    assert out_f32.shape == (x2d.shape[0], out_dim), out_f32.shape
    assert jnp.allclose(out_f32, ref2d, atol=1e-5, rtol=1e-5), "f32 mismatch vs reference"

    # (2) bf16 MXU-input path (v6e/v7x fast path), 2 grid steps to exercise the
    #     pipelined grid and feed both v7x TensorCores.  f32 accumulation keeps
    #     the error small; tolerance loosened for bf16 operand rounding.
    out_bf16 = mlp_forward_pallas(
        x2d, weights, biases,
        skip_connections=skip_connections,
        out_activation=out_activation,
        tm=128, mxu_dtype=jnp.bfloat16)
    out_bf16 = jax.block_until_ready(out_bf16)
    assert jnp.allclose(out_bf16, ref2d, atol=5e-2, rtol=5e-2), "bf16 mismatch vs reference"

    # Reshape back to the module's [*bs, out_dim] shape.
    out = out_f32.reshape(in_tensor.shape[:-1] + (out_dim,))
    assert out.shape == (2, 128, out_dim), out.shape

    print("KERNEL_OK")
</pallas_src>

<mosaic_0001>
module attributes {stable_mosaic.version = 11 : i64} {
  func.func @_mlp_kernel(%arg0: i32, %arg1: memref<104x128xf32, #tpu.memory_space<vmem>>, %arg2: memref<16x256xf32, #tpu.memory_space<vmem>>, %arg3: memref<8x256xf32, #tpu.memory_space<vmem>>) attributes {dimension_semantics = [#tpu.dimension_semantics<parallel>], iteration_bounds = array<i64: 1>, scalar_prefetch = 0 : i64, scratch_operands = 0 : i64, tpu.core_type = #tpu.core_type<tc>, window_params = [{pipeline_mode = #tpu.pipeline_mode<synchronous>, transform_indices = @transform_0, window_bounds = array<i64: 104, 128>}, {transform_indices = @transform_1, window_bounds = array<i64: 16, 256>}, {transform_indices = @transform_2, window_bounds = array<i64: 8, 256>}]} {
    %c0 = arith.constant 0 : index
    %c0_0 = arith.constant 0 : index
    %0 = vector.load %arg2[%c0, %c0_0] : memref<16x256xf32, #tpu.memory_space<vmem>>, vector<16x256xf32>
    %c0_1 = arith.constant 0 : index
    %c0_2 = arith.constant 0 : index
    %1 = vector.load %arg1[%c0_1, %c0_2] : memref<104x128xf32, #tpu.memory_space<vmem>>, vector<32x16xf32>
    %c0_3 = arith.constant 0 : index
    %c16 = arith.constant 16 : index
    %2 = vector.load %arg1[%c0_3, %c16] : memref<104x128xf32, #tpu.memory_space<vmem>>, vector<32x1xf32>
    %cst = arith.constant dense<0.000000e+00> : vector<32x256xf32>
    %3 = tpu.matmul %1, %0, %cst {dimension_numbers = #tpu.dot_dimension_numbers<[1], [0], [0], [1], [0, 0, 1, 1], [], []>} : vector<32x16xf32>, vector<16x256xf32>, vector<32x256xf32> -> vector<32x256xf32>
    %4 = vector.broadcast %2 : vector<32x1xf32> to vector<32x256xf32>
    %5 = arith.addf %3, %4 : vector<32x256xf32>
    %cst_4 = arith.constant 0.000000e+00 : f32
    %6 = vector.broadcast %cst_4 : f32 to vector<32x256xf32>
    %7 = arith.maximumf %5, %6 : vector<32x256xf32>
    %c32 = arith.constant 32 : index
    %c0_5 = arith.constant 0 : index
    %8 = vector.load %arg1[%c32, %c0_5] : memref<104x128xf32, #tpu.memory_space<vmem>>, vector<32x32xf32>
    %c32_6 = arith.constant 32 : index
    %c32_7 = arith.constant 32 : index
    %9 = vector.load %arg1[%c32_6, %c32_7] : memref<104x128xf32, #tpu.memory_space<vmem>>, vector<32x1xf32>
    %cst_8 = arith.constant dense<0.000000e+00> : vector<32x256xf32>
    %10 = tpu.matmul %8, %7, %cst_8 {dimension_numbers = #tpu.dot_dimension_numbers<[1], [0], [0], [1], [0, 0, 1, 1], [], []>} : vector<32x32xf32>, vector<32x256xf32>, vector<32x256xf32> -> vector<32x256xf32>
    %11 = vector.broadcast %9 : vector<32x1xf32> to vector<32x256xf32>
    %12 = arith.addf %10, %11 : vector<32x256xf32>
    %cst_9 = arith.constant 0.000000e+00 : f32
    %13 = vector.broadcast %cst_9 : f32 to vector<32x256xf32>
    %14 = arith.maximumf %12, %13 : vector<32x256xf32>
    %c64 = arith.constant 64 : index
    %c0_10 = arith.constant 0 : index
    %15 = vector.load %arg1[%c64, %c0_10] : memref<104x128xf32, #tpu.memory_space<vmem>>, vector<32x48xf32>
    %c64_11 = arith.constant 64 : index
    %c48 = arith.constant 48 : index
    %16 = vector.load %arg1[%c64_11, %c48] : memref<104x128xf32, #tpu.memory_space<vmem>>, vector<32x1xf32>
    %17 = vector.extract_strided_slice %15 {offsets = [0, 0], sizes = [32, 16], strides = [1, 1]} : vector<32x48xf32> to vector<32x16xf32>
    %18 = vector.extract_strided_slice %15 {offsets = [0, 16], sizes = [32, 32], strides = [1, 1]} : vector<32x48xf32> to vector<32x32xf32>
    %cst_12 = arith.constant dense<0.000000e+00> : vector<32x256xf32>
    %19 = tpu.matmul %17, %0, %cst_12 {dimension_numbers = #tpu.dot_dimension_numbers<[1], [0], [0], [1], [0, 0, 1, 1], [], []>} : vector<32x16xf32>, vector<16x256xf32>, vector<32x256xf32> -> vector<32x256xf32>
    %cst_13 = arith.constant dense<0.000000e+00> : vector<32x256xf32>
    %20 = tpu.matmul %18, %14, %cst_13 {dimension_numbers = #tpu.dot_dimension_numbers<[1], [0], [0], [1], [0, 0, 1, 1], [], []>} : vector<32x32xf32>, vector<32x256xf32>, vector<32x256xf32> -> vector<32x256xf32>
    %21 = arith.addf %19, %20 : vector<32x256xf32>
    %22 = vector.broadcast %16 : vector<32x1xf32> to vector<32x256xf32>
    %23 = arith.addf %21, %22 : vector<32x256xf32>
    %cst_14 = arith.constant 0.000000e+00 : f32
    %24 = vector.broadcast %cst_14 : f32 to vector<32x256xf32>
    %25 = arith.maximumf %23, %24 : vector<32x256xf32>
    %c96 = arith.constant 96 : index
    %c0_15 = arith.constant 0 : index
    %26 = vector.load %arg1[%c96, %c0_15] : memref<104x128xf32, #tpu.memory_space<vmem>>, vector<8x32xf32>
    %c96_16 = arith.constant 96 : index
    %c32_17 = arith.constant 32 : index
    %27 = vector.load %arg1[%c96_16, %c32_17] : memref<104x128xf32, #tpu.memory_space<vmem>>, vector<8x1xf32>
    %cst_18 = arith.constant dense<0.000000e+00> : vector<8x256xf32>
    %28 = tpu.matmul %26, %25, %cst_18 {dimension_numbers = #tpu.dot_dimension_numbers<[1], [0], [0], [1], [0, 0, 1, 1], [], []>} : vector<8x32xf32>, vector<32x256xf32>, vector<8x256xf32> -> vector<8x256xf32>
    %29 = vector.broadcast %27 : vector<8x1xf32> to vector<8x256xf32>
    %30 = arith.addf %28, %29 : vector<8x256xf32>
    %c0_19 = arith.constant 0 : index
    %c0_20 = arith.constant 0 : index
    %31 = vector.load %arg3[%c0_19, %c0_20] : memref<8x256xf32, #tpu.memory_space<vmem>>, vector<8x256xf32>
    tpu.vector_store %arg3[%c0_19, %c0_20], %30 {strides = array<i32>} : memref<8x256xf32, #tpu.memory_space<vmem>>, vector<8x256xf32>,
    return
  }
  func.func @transform_0(%arg0: i32) -> (i32, i32) {
    %c0_i32 = arith.constant 0 : i32
    %c0_i32_0 = arith.constant 0 : i32
    %c0_i32_1 = arith.constant 0 : i32
    return %c0_i32, %c0_i32_0 : i32, i32
  }
  func.func @transform_1(%arg0: i32) -> (i32, i32) {
    %c0_i32 = arith.constant 0 : i32
    %c0_i32_0 = arith.constant 0 : i32
    return %c0_i32, %arg0 : i32, i32
  }
  func.func @transform_2(%arg0: i32) -> (i32, i32) {
    %c0_i32 = arith.constant 0 : i32
    %c0_i32_0 = arith.constant 0 : i32
    return %c0_i32, %arg0 : i32, i32
  }
}

</mosaic_0001>

<bundles_post_ra>
// kernel: tpu_custom_call.1
= control target key start
LH: loop header
LB: loop body
LE: loop exit
PB: predicated region body
PF: predicated region fallthrough
CT: control target
= control target key end

     0   :  { %7 = vsyncpa [#allocation3], 0  ;;  %s919_s0 = inlined_call_operand.hbm [shape: f32[104,128], index: 0, kind: input, shape index: {}]   ;;  %s920_s1 = inlined_call_operand.hbm [shape: f32[16,256], index: 1, kind: input, shape index: {}]   ;;  %s921_s2 = inlined_call_operand.hbm [shape: f32[8,256], index: 2, kind: output, shape index: {}]  }
   0x1   :  { %8 = vsyncpa [#allocation6], 0 }
   0x2   :  { %9 = vsyncpa [#allocation4], 0  ;;  %s791_s9 = smov [#allocation2]   ;;  %s719_s13 = scalar_lea.hbm %s919_s0, 1664 }
   0x3   :  { %s15_s10 = sshll.u32 %s791_s9, 4  ;;  %p720_p0 = scmp.ne.s32.totalorder %s919_s0, %s719_s13  ;;  %s16_s10 = int_to_ptr.vmem [resolvable:$true] %s15_s10 }
   0x4   :  { %p723_p1 = scmp.lt.u32.totalorder %s719_s13, %s919_s0 }
   0x6   :  { %p725_p2 = pnand %p723_p1, %p720_p0 }
   0x8   :  { %728 = shalt.err (!%p725_p2)
}
   0x9   :  { %s729_s18 = scalar_lea.vmem %s16_s10, 1664  ;;  %p734_p4 = scmp.lt.s32.totalorder %s16_s10, %s16_s10 }
   0xa   :  { %p730_p3 = scmp.ne.s32.totalorder %s16_s10, %s729_s18  ;;  %p735_p5 = scmp.lt.s32.totalorder %s729_s18, %s729_s18 }
   0xc   :  { %p736_p6 = por %p735_p5, %p734_p4 }
   0xe   :  { %p737_p7 = pnand %p736_p6, %p730_p3 }
  0x10   :  { %740 = shalt.err (!%p737_p7)
}
  0x11   :  { %s792_s19 = smov 128   ;;  %s793_s20 = smov 8  }
  0x12   :  { %21 = dma.hbm_to_vmem [thread:$0]  %s919_s0, 1664, %s16_s10, [#allocation3], %s792_s19, %s792_s19, %s793_s20  }
  0x13   :  { %s794_s23 = smov [#allocation5]   ;;  %s741_s27 = scalar_lea.hbm %s920_s1, 512 }
  0x14   :  { %s27_s24 = sshll.u32 %s794_s23, 4  ;;  %p742_p8 = scmp.ne.s32.totalorder %s920_s1, %s741_s27  ;;  %s28_s24 = int_to_ptr.vmem [resolvable:$true] %s27_s24 }
  0x15   :  { %p745_p9 = scmp.lt.u32.totalorder %s741_s27, %s920_s1 }
  0x17   :  { %p747_p10 = pnand %p745_p9, %p742_p8 }
  0x19   :  { %750 = shalt.err (!%p747_p10)
}
  0x1a   :  { %s751_s4 = scalar_lea.vmem %s28_s24, 512  ;;  %p756_p12 = scmp.lt.s32.totalorder %s28_s24, %s28_s24 }
  0x1b   :  { %p752_p11 = scmp.ne.s32.totalorder %s28_s24, %s751_s4  ;;  %p757_p13 = scmp.lt.s32.totalorder %s751_s4, %s751_s4 }
  0x1d   :  { %p758_p0 = por %p757_p13, %p756_p12 }
  0x1f   :  { %p759_p1 = pnand %p758_p0, %p752_p11 }
  0x21   :  { %762 = shalt.err (!%p759_p1)
}
  0x22   :  { %s795_s0 = smov 256   ;;  %s796_s5 = smov 16  }
  0x23   :  { %33 = dma.hbm_to_vmem [thread:$0]  %s920_s1, 512, %s28_s24, [#allocation6], %s795_s0, %s795_s0, %s796_s5  }
  0x24   :  { %785 = dma.done.wait [#allocation3], 1664  }
  0x25   :  { %786 = vsyncadd [#allocation3], 4294965632 }
  0x26   :  { %787 = dma.done.wait [#allocation6], 512  }
  0x27   :  { %788 = vsyncadd [#allocation6], 4294966784  ;;  %v797_v0 = vmov 0.0   ;;  %v798_v1 = vmov 16   ;;  %v41_v2 = vld [vmem:[#allocation5 + $0x8] sm:$0xff]  ;;  %v43_v3 = vld [vmem:[#allocation5 + $0x18] sm:$0xff] }
  0x28   :  { %141 = vmatprep.mubr.f32.mxu1 %v797_v0  ;;  %712 = vset.pattern.permute.xlu0 %v798_v1  ;;  %v40_v4 = vld [vmem:[#allocation5] sm:$0xff]  ;;  %v844_v5 = vpack.c.bf16 %v43_v3, %v41_v2  ;;  %v42_v6 = vld [vmem:[#allocation5 + $0x10] sm:$0xff]  ;;  %v44_v7 = vld [vmem:[#allocation2] sm:$0xff]  ;;  %vm68_vm0 = vcmask 130048   ;;  %v799_v14 = vmov 32   ;;  %s800_s1 = smov 112  }
  0x29   :  { %713 = vset.pattern.permute.xlu1 %v798_v1  ;;  %392 = vmatprep.mubr.f32.mxu0 %v797_v0  ;;  %v846_v8 = vpack.c.bf16 %v42_v6, %v40_v4  ;;  %v46_v9 = vld [vmem:[#allocation2 + $0x10] sm:$0xff]  ;;  %v45_v10 = vld [vmem:[#allocation2 + $0x8] sm:$0xff]  ;;  %v47_v11 = vld [vmem:[#allocation2 + $0x18] sm:$0xff]  ;;  %vm198_vm1 = vcmask 261120   ;;  %v801_v53 = vmov 48   ;;  %s802_s8 = smov [#allocation7]  }
  0x2a   :  { %50 = vperm.xlu0 %712, %v44_v7   ;;  %661 = vmatprep.subr.bf16.mxu1 %v844_v5  ;;  %v174_v12 = vld [vmem:[#allocation2 + $0x20] sm:$0xff]  ;;  %v175_v13 = vld [vmem:[#allocation2 + $0x28] sm:$0xff]  ;;  %v176_v15 = vld [vmem:[#allocation2 + $0x30] sm:$0xff]  ;;  %s633_s9 = sshll.u32 %s802_s8, 4  ;;  %s634_s9 = int_to_ptr.vmem [resolvable:$true] %s633_s9 }
  0x2b   :  { %60 = vperm.xlu1 %713, %v46_v9   ;;  %663 = vmatpush1.bf16.msra.mxu1 %v846_v8  ;;  %v177_v16 = vld [vmem:[#allocation2 + $0x38] sm:$0xff]  ;;  %v860_v17 = vld [vmem:[#allocation2 + $0x40] sm:$0xff]  ;;  %v862_v18 = vld [vmem:[#allocation2 + $0x48] sm:$0xff]  ;;  %s763_s10 = scalar_lea.vmem %s634_s9, 256  ;;  %p768_p3 = scmp.lt.s32.totalorder %s634_s9, %s634_s9 }
  0x2c   :  { %v866_v19 = vld [vmem:[#allocation2 + $0x50] sm:$0xff]  ;;  %v868_v20 = vld [vmem:[#allocation2 + $0x58] sm:$0xff]  ;;  %p764_p2 = scmp.ne.s32.totalorder %s634_s9, %s763_s10  ;;  %p769_p4 = scmp.lt.s32.totalorder %s763_s10, %s763_s10 }
  0x2e   :  { %55 = vperm.xlu0 %712, %v45_v10   ;;  %643 = vmatmul.mubr.msk.f32.vlgmr.msra.gmra.mrb[0].mxu1 %vm68_vm0, %v44_v7  ;;  %p770_p5 = por %p769_p4, %p768_p3 }
  0x2f   :  { %65 = vperm.xlu1 %713, %v47_v11   ;;  %147 = vmatprep.mubr.f32.mxu1 %v797_v0 }
  0x30   :  { %p771_p6 = pnand %p770_p5, %p764_p2 }
  0x32   :  { %644 = vmatmul.mubr.msk.f32.gmra.mrb[2].mxu1 %vm68_vm0, %v45_v10  ;;  %714 = vset.pattern.permute.xlu0 %v799_v14 }
  0x33   :  { %153 = vmatprep.mubr.f32.mxu1 %v797_v0  ;;  %715 = vset.pattern.permute.xlu1 %v799_v14 }
  0x34   :  { %180 = vperm.xlu0 %714, %v174_v12   ;;  %185 = vperm.xlu1 %715, %v175_v13  }
  0x36   :  { %645 = vmatmul.mubr.msk.f32.gmra.mrb[4].mxu1 %vm68_vm0, %v46_v9 }
  0x37   :  { %159 = vmatprep.mubr.f32.mxu1 %v797_v0 }
  0x38   :  { %190 = vperm.xlu1 %715, %v176_v15   ;;  %195 = vperm.xlu0 %714, %v177_v16  }
  0x3a   :  { %646 = vmatmul.mubr.msk.f32.gmra.mrb[6].mxu1 %vm68_vm0, %v47_v11 }
  0x3b   :  { %271 = vmatprep.mubr.f32.mxu1 %v797_v0 }
  0x3c   :  { %312 = vrot.lane.b32.xlu1 %v860_v17, %s800_s1  ;;  %314 = vrot.lane.b32.xlu0 %v862_v18, %s800_s1 }
  0x3d   :  { %716 = vset.pattern.permute.xlu1 %v801_v53  ;;  %717 = vset.pattern.permute.xlu0 %v801_v53 }
  0x40   :  { %316 = vrot.lane.b32.xlu1 %v866_v19, %s800_s1  ;;  %318 = vrot.lane.b32.xlu0 %v868_v20, %s800_s1 }
  0x44   :  { %515 = vperm.xlu1 %716, %v860_v17   ;;  %519 = vperm.xlu0 %717, %v862_v18  }
  0x48   :  { %523 = vperm.xlu1 %716, %v866_v19   ;;  %718 = vset.pattern.permute.xlu0 %v799_v14 }
  0x4c   :  { %527 = vperm.xlu1 %716, %v868_v20  }
  0xa9   :  { %v51_v21 = vpop.permute.xlu0 %50 }
  0xaa   :  { %v61_v30 = vpop.permute.xlu1 %60 }
  0xad   :  { %v56_v24 = vpop.permute.xlu0 %55 }
  0xae   :  { %v66_v41 = vpop.permute.xlu1 %65 }
  0xb3   :  { %v181_v54 = vpop.permute.xlu0 %180  ;;  %v186_v57 = vpop.permute.xlu1 %185 }
  0xb7   :  { %v191_v6 = vpop.permute.xlu1 %190 }
 0x101   :  { %v143_v22 = vpop.f32.mrb[0].mxu1 }
 0x102   :  { %v145_v23 = vpop.f32.mrb[1].mxu1  ;;  %v144_v25 = vadd.f32 %v143_v22, %v51_v21 }
 0x103   :  { %v146_v26 = vadd.f32 %v145_v23, %v51_v21 }
 0x104   :  { %v166_v32 = vmax.f32 %v144_v25, 0.0 }
 0x105   :  { %v149_v27 = vpop.f32.mrb[2].mxu1  ;;  %v167_v34 = vmax.f32 %v146_v26, 0.0 }
 0x106   :  { %v150_v28 = vadd.f32 %v149_v27, %v56_v24  ;;  %v151_v29 = vpop.f32.mrb[3].mxu1 }
 0x107   :  { %v152_v31 = vadd.f32 %v151_v29, %v56_v24  ;;  %v313_v29 = vpop.permute.xlu1 %312 }
 0x108   :  { %v168_v33 = vmax.f32 %v150_v28, 0.0 }
 0x109   :  { %v169_v35 = vmax.f32 %v152_v31, 0.0  ;;  %v155_v36 = vpop.f32.mrb[4].mxu1 }
 0x10a   :  { %v666_v37 = vpack.c.bf16 %v168_v33, %v166_v32  ;;  %v157_v38 = vpop.f32.mrb[5].mxu1  ;;  %v156_v40 = vadd.f32 %v155_v36, %v61_v30 }
 0x10b   :  { %v664_v39 = vpack.c.bf16 %v169_v35, %v167_v34  ;;  %v158_v42 = vadd.f32 %v157_v38, %v61_v30  ;;  %v317_v31 = vpop.permute.xlu1 %316 }
 0x10c   :  { %v170_v47 = vmax.f32 %v156_v40, 0.0 }
 0x10d   :  { %v161_v43 = vpop.f32.mrb[6].mxu1  ;;  %665 = vmatprep.subr.bf16.mxu1 %v664_v39  ;;  %v171_v49 = vmax.f32 %v158_v42, 0.0 }
 0x10e   :  { %v162_v44 = vadd.f32 %v161_v43, %v66_v41  ;;  %v163_v45 = vpop.f32.mrb[7].mxu1  ;;  %667 = vmatpush1.bf16.msra.mxu1 %v666_v37 }
 0x10f   :  { %v164_v46 = vadd.f32 %v163_v45, %v66_v41 }
 0x110   :  { %v172_v48 = vmax.f32 %v162_v44, 0.0 }
 0x111   :  { %v173_v50 = vmax.f32 %v164_v46, 0.0 }
 0x112   :  { %v670_v51 = vpack.c.bf16 %v172_v48, %v170_v47 }
 0x113   :  { %v668_v52 = vpack.c.bf16 %v173_v50, %v171_v49 }
 0x115   :  { %669 = vmatprep.subr.bf16.mxu1 %v668_v52 }
 0x116   :  { %671 = vmatpush1.bf16.msra.mxu1 %v670_v51 }
 0x119   :  { %647 = vmatmul.mubr.msk.f32.vlgmr.msra.gmra.mrb[8].mxu1 %vm198_vm1, %v174_v12 }
 0x11a   :  { %277 = vmatprep.mubr.f32.mxu1 %v797_v0 }
 0x11d   :  { %648 = vmatmul.mubr.msk.f32.gmra.mrb[10].mxu1 %vm198_vm1, %v175_v13  ;;  %v196_v13 = vpop.permute.xlu0 %195 }
 0x11e   :  { %283 = vmatprep.mubr.f32.mxu1 %v797_v0 }
 0x121   :  { %649 = vmatmul.mubr.msk.f32.gmra.mrb[12].mxu1 %vm198_vm1, %v176_v15  ;;  %v315_v30 = vpop.permute.xlu0 %314 }
 0x122   :  { %289 = vmatprep.mubr.f32.mxu1 %v797_v0 }
 0x125   :  { %650 = vmatmul.mubr.msk.f32.gmra.mrb[14].mxu1 %vm198_vm1, %v177_v16  ;;  %v319_v32 = vpop.permute.xlu0 %318 }
 0x126   :  { %618 = vmatprep.mubr.f32.mxu1 %v797_v0 }
 0x129   :  { %v520_v34 = vpop.permute.xlu0 %519 }
 0x1ec   :  { %v273_v55 = vpop.f32.mrb[8].mxu1 }
 0x1ed   :  { %v275_v56 = vpop.f32.mrb[9].mxu1  ;;  %v274_v58 = vadd.f32 %v273_v55, %v181_v54 }
 0x1ee   :  { %v276_v59 = vadd.f32 %v275_v56, %v181_v54 }
 0x1ef   :  { %v296_v1 = vmax.f32 %v274_v58, 0.0 }
 0x1f0   :  { %v279_v60 = vpop.f32.mrb[10].mxu1  ;;  %v297_v3 = vmax.f32 %v276_v59, 0.0 }
 0x1f1   :  { %v280_v61 = vadd.f32 %v279_v60, %v186_v57  ;;  %v281_v62 = vpop.f32.mrb[11].mxu1 }
 0x1f2   :  { %v282_v63 = vadd.f32 %v281_v62, %v186_v57 }
 0x1f3   :  { %v298_v2 = vmax.f32 %v280_v61, 0.0 }
 0x1f4   :  { %v299_v4 = vmax.f32 %v282_v63, 0.0  ;;  %v285_v7 = vpop.f32.mrb[12].mxu1 }
 0x1f5   :  { %v287_v9 = vpop.f32.mrb[13].mxu1  ;;  %v674_v10 = vpack.c.bf16 %v298_v2, %v296_v1  ;;  %v286_v12 = vadd.f32 %v285_v7, %v191_v6 }
 0x1f6   :  { %v672_v11 = vpack.c.bf16 %v299_v4, %v297_v3  ;;  %v288_v14 = vadd.f32 %v287_v9, %v191_v6 }
 0x1f7   :  { %v300_v23 = vmax.f32 %v286_v12, 0.0 }
 0x1f8   :  { %v291_v15 = vpop.f32.mrb[14].mxu1  ;;  %673 = vmatprep.subr.bf16.mxu0 %v672_v11  ;;  %v301_v25 = vmax.f32 %v288_v14, 0.0 }
 0x1f9   :  { %v292_v16 = vadd.f32 %v291_v15, %v196_v13  ;;  %v293_v21 = vpop.f32.mrb[15].mxu1  ;;  %675 = vmatpush1.bf16.msra.mxu0 %v674_v10 }
 0x1fa   :  { %v294_v22 = vadd.f32 %v293_v21, %v196_v13 }
 0x1fb   :  { %v302_v24 = vmax.f32 %v292_v16, 0.0 }
 0x1fc   :  { %v303_v26 = vmax.f32 %v294_v22, 0.0 }
 0x1fd   :  { %v678_v27 = vpack.c.bf16 %v302_v24, %v300_v23 }
 0x1fe   :  { %v676_v28 = vpack.c.bf16 %v303_v26, %v301_v25 }
 0x200   :  { %677 = vmatprep.subr.bf16.mxu0 %v676_v28 }
 0x201   :  { %679 = vmatpush1.bf16.msra.mxu0 %v678_v27 }
 0x202   :  { %681 = vmatprep.subr.bf16.mxu0 %v844_v5  ;;  %v546_v5 = vld [vmem:[#allocation2 + $0x60] sm:$0xff] }
 0x203   :  { %549 = vperm.xlu0 %718, %v546_v5  }
 0x204   :  { %651 = vmatmul.mubr.msk.f32.vlgmr.msra.gmra.mrb[0].mxu0 %vm198_vm1, %v313_v29 }
 0x205   :  { %398 = vmatprep.mubr.f32.mxu0 %v797_v0  ;;  %683 = vmatpush1.bf16.msra.mxu0 %v846_v8  ;;  %v516_v8 = vpop.permute.xlu1 %515 }
 0x208   :  { %652 = vmatmul.mubr.msk.f32.gmra.mrb[2].mxu0 %vm198_vm1, %v315_v30 }
 0x209   :  { %404 = vmatprep.mubr.f32.mxu0 %v797_v0  ;;  %v524_v39 = vpop.permute.xlu1 %523 }
 0x20c   :  { %653 = vmatmul.mubr.msk.f32.gmra.mrb[4].mxu0 %vm198_vm1, %v317_v31 }
 0x20d   :  { %410 = vmatprep.mubr.f32.mxu0 %v797_v0  ;;  %v528_v47 = vpop.permute.xlu1 %527 }
 0x210   :  { %654 = vmatmul.mubr.msk.f32.gmra.mrb[6].mxu0 %vm198_vm1, %v319_v32 }
 0x211   :  { %489 = vmatprep.mubr.f32.mxu0 %v797_v0 }
 0x214   :  { %655 = vmatmul.mubr.msk.f32.vlgmr.msra.gmra.mrb[0].mxu0 %vm68_vm0, %v860_v17 }
 0x215   :  { %495 = vmatprep.mubr.f32.mxu0 %v797_v0 }
 0x218   :  { %656 = vmatmul.mubr.msk.f32.gmra.mrb[2].mxu0 %vm68_vm0, %v862_v18 }
 0x219   :  { %501 = vmatprep.mubr.f32.mxu0 %v797_v0 }
 0x21c   :  { %657 = vmatmul.mubr.msk.f32.gmra.mrb[4].mxu0 %vm68_vm0, %v866_v19 }
 0x21d   :  { %507 = vmatprep.mubr.f32.mxu0 %v797_v0 }
 0x220   :  { %658 = vmatmul.mubr.msk.f32.gmra.mrb[6].mxu0 %vm68_vm0, %v868_v20 }
 0x282   :  { %v550_v59 = vpop.permute.xlu0 %549 }
 0x2e7   :  { %v491_v33 = vpop.f32.mrb[0].mxu0 }
 0x2e8   :  { %v493_v17 = vpop.f32.mrb[1].mxu0  ;;  %v530_v35 = vadd.f32 %v516_v8, %v491_v33 }
 0x2e9   :  { %v531_v36 = vadd.f32 %v516_v8, %v493_v17 }
 0x2ea   :  { %v538_v41 = vmax.f32 %v530_v35, 0.0 }
 0x2eb   :  { %v497_v37 = vpop.f32.mrb[2].mxu0  ;;  %v539_v42 = vmax.f32 %v531_v36, 0.0 }
 0x2ec   :  { %v532_v18 = vadd.f32 %v520_v34, %v497_v37  ;;  %v499_v38 = vpop.f32.mrb[3].mxu0 }
 0x2ed   :  { %v533_v40 = vadd.f32 %v520_v34, %v499_v38 }
 0x2ee   :  { %v540_v19 = vmax.f32 %v532_v18, 0.0 }
 0x2ef   :  { %v541_v0 = vmax.f32 %v533_v40, 0.0  ;;  %v503_v43 = vpop.f32.mrb[4].mxu0 }
 0x2f0   :  { %v686_v44 = vpack.c.bf16 %v540_v19, %v538_v41  ;;  %v505_v20 = vpop.f32.mrb[5].mxu0  ;;  %v534_v46 = vadd.f32 %v524_v39, %v503_v43 }
 0x2f1   :  { %v684_v45 = vpack.c.bf16 %v541_v0, %v539_v42  ;;  %v535_v48 = vadd.f32 %v524_v39, %v505_v20 }
 0x2f2   :  { %v542_v53 = vmax.f32 %v534_v46, 0.0 }
 0x2f3   :  { %v509_v49 = vpop.f32.mrb[6].mxu0  ;;  %685 = vmatprep.subr.bf16.mxu1 %v684_v45  ;;  %v543_v55 = vmax.f32 %v535_v48, 0.0 }
 0x2f4   :  { %v536_v50 = vadd.f32 %v528_v47, %v509_v49  ;;  %v511_v51 = vpop.f32.mrb[7].mxu0  ;;  %687 = vmatpush1.bf16.msra.mxu1 %v686_v44 }
 0x2f5   :  { %v537_v52 = vadd.f32 %v528_v47, %v511_v51 }
 0x2f6   :  { %v544_v54 = vmax.f32 %v536_v50, 0.0 }
 0x2f7   :  { %v545_v56 = vmax.f32 %v537_v52, 0.0 }
 0x2f8   :  { %v690_v57 = vpack.c.bf16 %v544_v54, %v542_v53 }
 0x2f9   :  { %v688_v58 = vpack.c.bf16 %v545_v56, %v543_v55 }
 0x2fb   :  { %689 = vmatprep.subr.bf16.mxu1 %v688_v58 }
 0x2fc   :  { %691 = vmatpush1.bf16.msra.mxu1 %v690_v57 }
 0x2ff   :  { %659 = vmatmul.mubr.msk.f32.vlgmr.msra.gmra.mrb[16].mxu1 %vm198_vm1, %v546_v5 }
 0x3d2   :  { %v620_v60 = vpop.f32.mrb[16].mxu1 }
 0x3d3   :  { %v621_v61 = vadd.f32 %v620_v60, %v550_v59  ;;  %v622_v62 = vpop.f32.mrb[17].mxu1 }
 0x3d4   :  { %v623_v63 = vadd.f32 %v622_v62, %v550_v59 }
 0x3d5   :  { %625 = vst [vmem:[#allocation7] sm:$0xff] %v621_v61 }
 0x3d6   :  { %626 = vst [vmem:[#allocation7 + $0x8] sm:$0xff] %v623_v63 }
 0x3d7   :  { %774 = shalt.err (!%p771_p6)
}
 0x3d8   :  { %s775_s13 = scalar_lea.hbm %s921_s2, 256 }
 0x3d9   :  { %p776_p7 = scmp.ne.s32.totalorder %s921_s2, %s775_s13  ;;  %p779_p8 = scmp.lt.u32.totalorder %s775_s13, %s921_s2 }
 0x3db   :  { %p781_p9 = pnand %p779_p8, %p776_p7 }
 0x3dd   :  { %784 = shalt.err (!%p781_p9)
}
 0x3de   :  { %636 = dma.vmem_to_hbm [thread:$0]  %s634_s9, 256, %s921_s2, [#allocation4]  }
 0x3df   :  { %789 = dma.done.wait [#allocation4], 256  }
 0x3e0   :  { %790 = vsyncadd [#allocation4], 4294967040 }
 0x3e1   :  { %640 = vsyncpa [#allocation3], 1 }
 0x3e2   :  { %641 = vsyncpa [#allocation6], 1 }
 0x3e3   :  { %642 = vsyncpa [#allocation4], 1 }

</bundles_post_ra>
